<compile_context>
chip_gen: v7x
topology: tpu7x:2x2x1
jax: 0.10.0
libtpu: 0.0.40
codegen_flags: <defaults>
</compile_context>

<pallas_src>
import jax
import jax.numpy as jnp
from jax import lax
from jax.experimental import pallas as pl
from jax.experimental.pallas import tpu as pltpu

LANES = 128
SUBLANES = 8
MAX_TILE_ROWS = 4096   # (4096,128) f32 = 2 MiB per input tile; 2 inputs x 2 buffers
                       # = 8 MiB, inside the default scoped VMEM on every generation
CHUNK_ROWS = 64        # 64x128 f32 = 8 vregs per operand: whole chain stays in vregs
EPS = 1e-8             # PyTorch PoissonNLLLoss default eps


def _make_kernel(n_snps: float, tile_rows: int, valid_rows: int, needs_mask: bool):
    n_full = tile_rows // CHUNK_ROWS
    rem = tile_rows % CHUNK_ROWS

    def accum_chunk(preds_ref, true_ref, out_ref, r0, nrows, global_row0):
        # PoissonNLLLoss(log_input=False, full=False): input - target*log(input+eps)
        p = preds_ref[pl.ds(r0, nrows), :].astype(jnp.float32) * jnp.float32(n_snps)
        t = true_ref[pl.ds(r0, nrows), :].astype(jnp.float32)
        loss = p - t * jnp.log(p + jnp.float32(EPS))
        if needs_mask:
            # Last grid block may extend past the array; those rows hold
            # unspecified data -> mask them out (cheap VPU filler).
            row = lax.broadcasted_iota(jnp.int32, (nrows, LANES), 0) + global_row0
            loss = jnp.where(row < valid_rows, loss, 0.0)
        # Collapse only the sublane-block axis (pure VPU adds) into the
        # resident (8,128) accumulator.
        out_ref[...] += loss.reshape(nrows // SUBLANES, SUBLANES, LANES).sum(axis=0)

    def kernel(preds_ref, true_ref, out_ref):
        i = pl.program_id(0)

        @pl.when(i == 0)
        def _():
            out_ref[...] = jnp.zeros_like(out_ref)

        tile_row0 = i * tile_rows

        if n_full > 0:
            def body(c, carry):
                r0 = pl.multiple_of(c * CHUNK_ROWS, CHUNK_ROWS)
                accum_chunk(preds_ref, true_ref, out_ref, r0, CHUNK_ROWS, tile_row0 + r0)
                return carry
            lax.fori_loop(0, n_full, body, 0)

        if rem > 0:
            r0 = n_full * CHUNK_ROWS
            accum_chunk(preds_ref, true_ref, out_ref, r0, rem, tile_row0 + r0)

    return kernel


def poisson_loss(preds, true, n_snps: int = 32):
    """Mean Poisson NLL of (preds * n_snps) vs true, matching the PyTorch module."""
    assert preds.shape == true.shape
    total = preds.size

    flat_p = preds.reshape(-1)
    flat_t = true.reshape(-1)

    # Pad only to the next multiple of 8*128 = 1024 elements. For typical NN
    # tensors this pad is 0 and the reshape below is a free view; padded
    # (p=0, t=0) elements contribute exactly 0 loss.
    pad = (-total) % (SUBLANES * LANES)
    if pad:
        flat_p = jnp.pad(flat_p, (0, pad))
        flat_t = jnp.pad(flat_t, (0, pad))

    rows = (total + pad) // LANES            # multiple of 8, >= 8
    tile_rows = min(MAX_TILE_ROWS, rows)     # multiple of 8
    grid = pl.cdiv(rows, tile_rows)
    needs_mask = (rows % tile_rows) != 0     # ragged last row-tile -> in-kernel mask

    preds2d = flat_p.reshape(rows, LANES)
    true2d = flat_t.reshape(rows, LANES)

    kernel = _make_kernel(float(n_snps), tile_rows, rows, needs_mask)

    partial = pl.pallas_call(
        kernel,
        out_shape=jax.ShapeDtypeStruct((SUBLANES, LANES), jnp.float32),
        grid_spec=pltpu.PrefetchScalarGridSpec(
            num_scalar_prefetch=0,
            grid=(grid,),
            in_specs=[
                pl.BlockSpec((tile_rows, LANES), lambda i: (i, 0)),
                pl.BlockSpec((tile_rows, LANES), lambda i: (i, 0)),
            ],
            # Same output block across the grid -> stays resident in VMEM and
            # acts as the accumulator (grid axis must be "arbitrary").
            out_specs=pl.BlockSpec((SUBLANES, LANES), lambda i: (0, 0)),
        ),
        compiler_params=pltpu.CompilerParams(
            dimension_semantics=("arbitrary",),
        ),
        cost_estimate=pl.CostEstimate(
            flops=4 * total,
            transcendentals=total,
            bytes_accessed=8 * total + 4 * SUBLANES * LANES,
        ),
    )(preds2d, true2d)

    # Single cross-lane/sublane reduce + mean scale done outside the kernel.
    return jnp.sum(partial) * jnp.float32(1.0 / total)


def poisson_loss_ref(preds, true, n_snps: int = 32):
    p = preds.astype(jnp.float32) * n_snps
    t = true.astype(jnp.float32)
    return jnp.mean(p - t * jnp.log(p + 1e-8))


if __name__ == "__main__":
    key = jax.random.PRNGKey(0)
    k1, k2 = jax.random.split(key)

    # NCHW inputs: batch=2, channels=4, spatial=16x16 (2*4*16*16 = 2048 elems)
    shape = (2, 4, 16, 16)
    # preds: non-negative rates (log_input=False expects rate-space predictions)
    preds = jax.random.uniform(k1, shape, dtype=jnp.float32, minval=0.01, maxval=1.0)
    # true: non-negative counts
    true = jax.random.poisson(k2, lam=3.0, shape=shape).astype(jnp.float32)

    out = poisson_loss(preds, true, n_snps=32)
    out = jax.block_until_ready(out)

    ref = poisson_loss_ref(preds, true, n_snps=32)
    assert jnp.allclose(out, ref, rtol=1e-5, atol=1e-5), (out, ref)

    print("KERNEL_OK")
</pallas_src>

<mosaic_0001>
module attributes {stable_mosaic.version = 11 : i64} {
  func.func @kernel(%arg0: i32, %arg1: memref<16x128xf32, #tpu.memory_space<vmem>>, %arg2: memref<16x128xf32, #tpu.memory_space<vmem>>, %arg3: memref<8x128xf32, #tpu.memory_space<vmem>>) attributes {dimension_semantics = [#tpu.dimension_semantics<arbitrary>], iteration_bounds = array<i64: 1>, scalar_prefetch = 0 : i64, scratch_operands = 0 : i64, tpu.core_type = #tpu.core_type<tc>, window_params = [{transform_indices = @transform_0, window_bounds = array<i64: 16, 128>}, {transform_indices = @transform_1, window_bounds = array<i64: 16, 128>}, {pipeline_mode = #tpu.pipeline_mode<synchronous>, transform_indices = @transform_2, window_bounds = array<i64: 8, 128>}]} {
    %c0_i32 = arith.constant 0 : i32
    %0 = arith.cmpi eq, %arg0, %c0_i32 : i32
    %1 = arith.extui %0 : i1 to i32
    %c0_i32_0 = arith.constant 0 : i32
    %2 = arith.cmpi ne, %1, %c0_i32_0 : i32
    scf.if %2 {
      %cst_10 = arith.constant 0.000000e+00 : f32
      %17 = vector.broadcast %cst_10 : f32 to vector<8x128xf32>
      %c0_11 = arith.constant 0 : index
      %c0_12 = arith.constant 0 : index
      %18 = vector.load %arg3[%c0_11, %c0_12] : memref<8x128xf32, #tpu.memory_space<vmem>>, vector<8x128xf32>
      tpu.vector_store %arg3[%c0_11, %c0_12], %17 {strides = array<i32>} : memref<8x128xf32, #tpu.memory_space<vmem>>, vector<8x128xf32>,
    } else {
    }
    %c0 = arith.constant 0 : index
    %c0_1 = arith.constant 0 : index
    %3 = vector.load %arg1[%c0, %c0_1] : memref<16x128xf32, #tpu.memory_space<vmem>>, vector<16x128xf32>
    %cst = arith.constant 3.200000e+01 : f32
    %4 = vector.broadcast %cst : f32 to vector<16x128xf32>
    %5 = arith.mulf %3, %4 : vector<16x128xf32>
    %c0_2 = arith.constant 0 : index
    %c0_3 = arith.constant 0 : index
    %6 = vector.load %arg2[%c0_2, %c0_3] : memref<16x128xf32, #tpu.memory_space<vmem>>, vector<16x128xf32>
    %cst_4 = arith.constant 9.99999993E-9 : f32
    %7 = vector.broadcast %cst_4 : f32 to vector<16x128xf32>
    %8 = arith.addf %5, %7 : vector<16x128xf32>
    %9 = math.log %8 : vector<16x128xf32>
    %10 = arith.mulf %6, %9 : vector<16x128xf32>
    %11 = arith.subf %5, %10 : vector<16x128xf32>
    %c0_5 = arith.constant 0 : index
    %c0_6 = arith.constant 0 : index
    %12 = vector.load %arg3[%c0_5, %c0_6] : memref<8x128xf32, #tpu.memory_space<vmem>>, vector<8x128xf32>
    %13 = vector.shape_cast %11 : vector<16x128xf32> to vector<2x8x128xf32>
    %cst_7 = arith.constant dense<0.000000e+00> : vector<8x128xf32>
    %14 = vector.multi_reduction <add>, %13, %cst_7 [0] : vector<2x8x128xf32> to vector<8x128xf32>
    %15 = arith.addf %12, %14 : vector<8x128xf32>
    %c0_8 = arith.constant 0 : index
    %c0_9 = arith.constant 0 : index
    %16 = vector.load %arg3[%c0_8, %c0_9] : memref<8x128xf32, #tpu.memory_space<vmem>>, vector<8x128xf32>
    tpu.vector_store %arg3[%c0_8, %c0_9], %15 {strides = array<i32>} : memref<8x128xf32, #tpu.memory_space<vmem>>, vector<8x128xf32>,
    return
  }
  func.func @transform_0(%arg0: i32) -> (i32, i32) {
    %c0_i32 = arith.constant 0 : i32
    %c0_i32_0 = arith.constant 0 : i32
    return %arg0, %c0_i32 : i32, i32
  }
  func.func @transform_1(%arg0: i32) -> (i32, i32) {
    %c0_i32 = arith.constant 0 : i32
    %c0_i32_0 = arith.constant 0 : i32
    return %arg0, %c0_i32 : i32, i32
  }
  func.func @transform_2(%arg0: i32) -> (i32, i32) {
    %c0_i32 = arith.constant 0 : i32
    %c0_i32_0 = arith.constant 0 : i32
    %c0_i32_1 = arith.constant 0 : i32
    return %c0_i32, %c0_i32_0 : i32, i32
  }
}

</mosaic_0001>

<bundles_post_ra>
// kernel: tpu_custom_call.1
= control target key start
LH: loop header
LB: loop body
LE: loop exit
PB: predicated region body
PF: predicated region fallthrough
CT: control target
= control target key end

     0   :  { %7 = vsyncpa [#allocation3], 0  ;;  %s219_s0 = inlined_call_operand.hbm [shape: f32[16,128], index: 0, kind: input, shape index: {}]   ;;  %s220_s1 = inlined_call_operand.hbm [shape: f32[16,128], index: 1, kind: input, shape index: {}]   ;;  %s221_s2 = inlined_call_operand.hbm [shape: f32[8,128], index: 2, kind: output, shape index: {}]  }
   0x1   :  { %8 = vsyncpa [#allocation6], 0 }
   0x2   :  { %9 = vsyncpa [#allocation4], 0  ;;  %s163_s9 = smov [#allocation2]   ;;  %s91_s13 = scalar_lea.hbm %s219_s0, 256 }
   0x3   :  { %s15_s10 = sshll.u32 %s163_s9, 4  ;;  %p92_p0 = scmp.ne.s32.totalorder %s219_s0, %s91_s13  ;;  %s16_s10 = int_to_ptr.vmem [resolvable:$true] %s15_s10 }
   0x4   :  { %p95_p1 = scmp.lt.u32.totalorder %s91_s13, %s219_s0 }
   0x6   :  { %p97_p2 = pnand %p95_p1, %p92_p0 }
   0x8   :  { %100 = shalt.err (!%p97_p2)
}
   0x9   :  { %s101_s18 = scalar_lea.vmem %s16_s10, 256  ;;  %p106_p4 = scmp.lt.s32.totalorder %s16_s10, %s16_s10 }
   0xa   :  { %p102_p3 = scmp.ne.s32.totalorder %s16_s10, %s101_s18  ;;  %p107_p5 = scmp.lt.s32.totalorder %s101_s18, %s101_s18 }
   0xc   :  { %p108_p6 = por %p107_p5, %p106_p4 }
   0xe   :  { %p109_p7 = pnand %p108_p6, %p102_p3 }
  0x10   :  { %112 = shalt.err (!%p109_p7)
}
  0x11   :  { %s164_s19 = smov 128   ;;  %s165_s20 = smov 8  }
  0x12   :  { %21 = dma.hbm_to_vmem [thread:$0]  %s219_s0, 256, %s16_s10, [#allocation3], %s164_s19, %s164_s19, %s165_s20  }
  0x13   :  { %s166_s23 = smov [#allocation5]   ;;  %s113_s27 = scalar_lea.hbm %s220_s1, 256 }
  0x14   :  { %s27_s24 = sshll.u32 %s166_s23, 4  ;;  %p114_p8 = scmp.ne.s32.totalorder %s220_s1, %s113_s27  ;;  %s28_s24 = int_to_ptr.vmem [resolvable:$true] %s27_s24 }
  0x15   :  { %p117_p9 = scmp.lt.u32.totalorder %s113_s27, %s220_s1 }
  0x17   :  { %p119_p10 = pnand %p117_p9, %p114_p8 }
  0x19   :  { %122 = shalt.err (!%p119_p10)
}
  0x1a   :  { %s123_s4 = scalar_lea.vmem %s28_s24, 256  ;;  %p128_p12 = scmp.lt.s32.totalorder %s28_s24, %s28_s24 }
  0x1b   :  { %p124_p11 = scmp.ne.s32.totalorder %s28_s24, %s123_s4  ;;  %p129_p13 = scmp.lt.s32.totalorder %s123_s4, %s123_s4 }
  0x1d   :  { %p130_p0 = por %p129_p13, %p128_p12 }
  0x1f   :  { %p131_p1 = pnand %p130_p0, %p124_p11 }
  0x21   :  { %134 = shalt.err (!%p131_p1)
}
  0x22   :  { %33 = dma.hbm_to_vmem [thread:$0]  %s220_s1, 256, %s28_s24, [#allocation6], %s164_s19, %s164_s19, %s165_s20  }
  0x23   :  { %157 = dma.done.wait [#allocation3], 256  }
  0x24   :  { %158 = vsyncadd [#allocation3], 4294967040 }
  0x25   :  { %159 = dma.done.wait [#allocation6], 256  }
  0x26   :  { %160 = vsyncadd [#allocation6], 4294967040  ;;  %v45_v0 = vld [vmem:[#allocation2] sm:$0xff]  ;;  %v46_v1 = vld [vmem:[#allocation2 + $0x8] sm:$0xff]  ;;  %s167_s1 = smov [#allocation7]  }
  0x27   :  { %v47_v2 = vmul.f32 32.0, %v45_v0  ;;  %v48_v3 = vmul.f32 32.0, %v46_v1  ;;  %v49_v7 = vld [vmem:[#allocation5] sm:$0xff]  ;;  %v50_v9 = vld [vmem:[#allocation5 + $0x8] sm:$0xff]  ;;  %s71_s6 = sshll.u32 %s167_s1, 4  ;;  %s72_s6 = int_to_ptr.vmem [resolvable:$true] %s71_s6 }
  0x28   :  { %s135_s7 = scalar_lea.vmem %s72_s6, 128  ;;  %p140_p3 = scmp.lt.s32.totalorder %s72_s6, %s72_s6 }
  0x29   :  { %v51_v4 = vadd.f32 1e-08, %v47_v2  ;;  %v52_v5 = vadd.f32 1e-08, %v48_v3  ;;  %p136_p2 = scmp.ne.s32.totalorder %s72_s6, %s135_s7  ;;  %p141_p4 = scmp.lt.s32.totalorder %s135_s7, %s135_s7 }
  0x2b   :  { %87 = vlog2.f32 %v51_v4  ;;  %p142_p5 = por %p141_p4, %p140_p3 }
  0x2c   :  { %89 = vlog2.f32 %v52_v5 }
  0x2d   :  { %p143_p6 = pnand %p142_p5, %p136_p2 }
  0x35   :  { %v88_v6 = vpop.eup %87 }
  0x36   :  { %v90_v8 = vpop.eup %89  ;;  %v54_v10 = vmul.f32 0.6931472, %v88_v6 }
  0x37   :  { %v56_v11 = vmul.f32 0.6931472, %v90_v8 }
  0x38   :  { %v57_v12 = vmul.f32 %v54_v10, %v49_v7 }
  0x39   :  { %v58_v13 = vmul.f32 %v56_v11, %v50_v9 }
  0x3a   :  { %v59_v14 = vsub.f32 %v47_v2, %v57_v12 }
  0x3b   :  { %v60_v15 = vsub.f32 %v48_v3, %v58_v13 }
  0x3d   :  { %v62_v16 = vadd.f32 %v60_v15, %v59_v14 }
  0x3f   :  { %64 = vst [vmem:[#allocation7] sm:$0xff] %v62_v16 }
  0x40   :  { %146 = shalt.err (!%p143_p6)
}
  0x41   :  { %s147_s10 = scalar_lea.hbm %s221_s2, 128 }
  0x42   :  { %p148_p7 = scmp.ne.s32.totalorder %s221_s2, %s147_s10  ;;  %p151_p8 = scmp.lt.u32.totalorder %s147_s10, %s221_s2 }
  0x44   :  { %p153_p9 = pnand %p151_p8, %p148_p7 }
  0x46   :  { %156 = shalt.err (!%p153_p9)
}
  0x47   :  { %74 = dma.vmem_to_hbm [thread:$0]  %s72_s6, 128, %s221_s2, [#allocation4]  }
  0x48   :  { %161 = dma.done.wait [#allocation4], 128  }
  0x49   :  { %162 = vsyncadd [#allocation4], 4294967168 }
  0x4a   :  { %78 = vsyncpa [#allocation3], 1 }
  0x4b   :  { %79 = vsyncpa [#allocation6], 1 }
  0x4c   :  { %80 = vsyncpa [#allocation4], 1 }

</bundles_post_ra>
